<compile_context>
chip_gen: v7x
topology: tpu7x:2x2x1
jax: 0.10.0
libtpu: 0.0.40
codegen_flags: <defaults>
</compile_context>

<pallas_src>
import functools
import math

import jax
import jax.numpy as jnp
from jax.experimental import pallas as pl
from jax.experimental.pallas import tpu as pltpu

EPS = 1e-5  # MaxNormActivation epsilon (config.eps)


def _danet_local_kernel(x_ref, mask_ref, wq_ref, w1_ref, w2_ref, o_ref, *,
                        window_size, tokens, hidden, mxu_dtype):
    """One tile of `tokens` tokens; full DANet block fused.

    x_ref:    (T, D)  or lane-dense (T//p, p*D)  hidden states
    mask_ref: (T, 1)  local attention mask
    wq_ref:   (D, D)  query projection (no bias)
    w1_ref:   (D, E)  FFN expanding weight
    w2_ref:   (E, D)  FFN shrinking weight
    o_ref:    same layout as x_ref
    """
    W, T, D = window_size, tokens, hidden
    nw = T // W

    def mx(v):  # cast large-matmul operands only (accumulation stays f32)
        return v if mxu_dtype is None else v.astype(mxu_dtype)

    x = x_ref[...]
    if x.shape != (T, D):
        # Lane-dense tile (T//p, p*D) -> (T, D); single relayout on the
        # otherwise-idle XLU path.
        x = x.reshape(T, D)
    x = x.astype(jnp.float32)
    prev = x

    # MaxNormActivation with the attention mask folded into the (T, 1) scale:
    # one broadcast multiply over D instead of two.
    inv = pl.reciprocal(
        jnp.max(jnp.abs(x), axis=-1, keepdims=True) + EPS, approx=True)
    h = x * (inv * mask_ref[...].astype(jnp.float32))

    # DenseLocalAttention (softmax-free). q-projection over the whole token
    # slab (bf16 MXU operands when requested); the two tiny per-window matmuls
    # stay f32 (8-wide shapes gain nothing from bf16) and are batched over the
    # window dim via einsum -> no explicit transpose.
    q = jnp.dot(mx(h), wq_ref[...], preferred_element_type=jnp.float32)       # (T, D)
    hw = h.reshape(nw, W, D)
    qw = q.reshape(nw, W, D)
    s = jnp.einsum("nwd,nvd->nwv", qw, hw,
                   preferred_element_type=jnp.float32)                        # (nw, W, W)
    a = jnp.einsum("nwv,nvd->nwd", s, hw,
                   preferred_element_type=jnp.float32)                        # (nw, W, D)
    a = a.reshape(T, D)

    # ExpandedFFN: gelu(a @ W1) @ W2   (bf16 MXU operands when requested)
    f = jnp.dot(mx(a), w1_ref[...], preferred_element_type=jnp.float32)       # (T, E)
    f = jax.nn.gelu(f, approximate=True)
    y = jnp.dot(mx(f), w2_ref[...], preferred_element_type=jnp.float32)       # (T, D)

    # MaxNormActivation after FFN, then residual.
    inv2 = pl.reciprocal(
        jnp.max(jnp.abs(y), axis=-1, keepdims=True) + EPS, approx=True)
    out = (y * inv2 + prev).astype(o_ref.dtype)
    if out.shape != o_ref.shape:
        out = out.reshape(o_ref.shape)   # repack lane-dense for an unmasked store
    o_ref[...] = out


def _pick_tokens_per_tile(total, window_size, quantum, target):
    """Largest clean tile <= target; single step when the input is small."""
    if total <= target:
        return total                      # grid=(1,): no per-step overhead
    q = math.lcm(window_size, quantum)    # window + sublane-tiling granularity
    divs = [t for t in range(q, min(total, target) + 1, q) if total % t == 0]
    if not divs:
        return total                      # no clean split; run one large step
    even = [t for t in divs if (total // t) % 2 == 0]   # v7x: even step count
    pool = even if even else divs
    return max(pool)


def danet_layer_local(x, mask, wq, w1, w2, *, window_size, tokens_per_tile=None,
                      mxu_dtype=None, lane_pack=True, target_tokens_per_tile=4096):
    """Fused DANet local-attention layer.

    x:    (B, N, D) hidden states (f32 or bf16 at the boundary)
    mask: (B, N, 1) local attention mask (== attention_mask[0])
    mxu_dtype: e.g. jnp.bfloat16 to feed the q-projection / FFN matmuls at
               bf16 MXU rate on v6e/v7x (accumulation stays f32). None = f32.
    """
    B, N, D = x.shape
    W = window_size
    assert N % W == 0, "sequence length must be a multiple of window_size"
    E = w1.shape[1]
    total = B * N

    # Lane-dense packing factor: 4 tokens of D=32 per 128-lane row.
    pack = 1
    if lane_pack and D < 128 and 128 % D == 0 and total % (128 // D) == 0:
        pack = 128 // D

    # Sublane quantum of the activation tiles (f32: 8, bf16: 16, int8/fp8: 32).
    itemsize = jnp.dtype(x.dtype).itemsize
    sub = 8 if itemsize >= 4 else (16 if itemsize == 2 else 32)

    if mxu_dtype is not None:
        # Cast weights once in the wrapper: halves their DMA bytes as well.
        wq, w1, w2 = (w.astype(mxu_dtype) for w in (wq, w1, w2))

    mask_flat = mask.reshape(total, 1).astype(jnp.float32)

    cost = pl.CostEstimate(
        flops=2 * total * (D * D + 2 * W * D + 2 * D * E),
        transcendentals=total * E,                       # gelu
        bytes_accessed=(2 * total * D * itemsize
                        + mask_flat.size * 4
                        + sum(int(w.size) * jnp.dtype(w.dtype).itemsize
                              for w in (wq, w1, w2))),
    )

    def _run(p):
        if tokens_per_tile is None:
            T = _pick_tokens_per_tile(total, W, p * sub, target_tokens_per_tile)
        else:
            T = tokens_per_tile
        assert T % W == 0 and total % T == 0 and T % p == 0
        assert T == total or (T // p) % sub == 0
        rows, lanes = T // p, p * D

        kernel = functools.partial(_danet_local_kernel, window_size=W,
                                   tokens=T, hidden=D, mxu_dtype=mxu_dtype)
        out = pl.pallas_call(
            kernel,
            out_shape=jax.ShapeDtypeStruct((total // p, p * D), x.dtype),
            grid=(total // T,),
            in_specs=[
                pl.BlockSpec((rows, lanes), lambda i: (i, 0)),
                pl.BlockSpec((T, 1), lambda i: (i, 0)),
                # Grid-invariant weights: constant index_map, fetched once.
                pl.BlockSpec((D, D), lambda i: (0, 0)),
                pl.BlockSpec((D, E), lambda i: (0, 0)),
                pl.BlockSpec((E, D), lambda i: (0, 0)),
            ],
            out_specs=pl.BlockSpec((rows, lanes), lambda i: (i, 0)),
            compiler_params=pltpu.CompilerParams(
                dimension_semantics=("parallel",)),
            cost_estimate=cost,
        )(x.reshape(total // p, p * D), mask_flat, wq, w1, w2)
        return out.reshape(B, N, D)

    if pack > 1:
        try:
            return jax.block_until_ready(_run(pack))
        except Exception:
            # TODO(synk): this Mosaic build rejected the lane-dense
            # (rows,128)<->(T,D) in-kernel relayout; fall back to the D-lane
            # layout (identical math, masked stores).
            pass
    return jax.block_until_ready(_run(1))


def danet_layer_local_reference(x, mask, wq, w1, w2, *, window_size):
    """Pure-JAX reference of the same forward pass (for validation)."""
    B, N, D = x.shape
    W = window_size
    prev = x
    h = x / (jnp.max(jnp.abs(x), axis=-1, keepdims=True) + EPS)
    h = h * mask
    hw = h.reshape(B, N // W, W, D)
    q = hw @ wq
    s = jnp.einsum("bnwd,bnvd->bnwv", q, hw)
    attn = jnp.einsum("bnwv,bnvd->bnwd", s, hw).reshape(B, N, D)
    f = jax.nn.gelu(attn @ w1, approximate=True)
    y = f @ w2
    y = y / (jnp.max(jnp.abs(y), axis=-1, keepdims=True) + EPS)
    return y + prev


if __name__ == "__main__":
    # Small config consistent with the module: hidden=32, seq=32, window=8,
    # FFN expansion factor = 2, batch=2.
    B, N, D, W = 2, 32, 32, 8
    EXPANSION = 2
    E = D * EXPANSION

    key = jax.random.PRNGKey(0)
    k_x, k_m, k_q, k_1, k_2 = jax.random.split(key, 5)

    x = jax.random.normal(k_x, (B, N, D), dtype=jnp.float32)
    # attention_mask is a pair (local_mask, global_mask); this layer uses [0].
    local_mask = (jax.random.uniform(k_m, (B, N, 1)) > 0.1).astype(jnp.float32)
    global_mask = jnp.ones((B, N, 1), dtype=jnp.float32)
    attention_mask = (local_mask, global_mask)

    # Deterministic synthetic parameter init (shapes from the module's __init__).
    wq = 0.02 * jax.random.normal(k_q, (D, D), dtype=jnp.float32)
    w1 = 0.02 * jax.random.normal(k_1, (D, E), dtype=jnp.float32)
    w2 = 0.02 * jax.random.normal(k_2, (E, D), dtype=jnp.float32)

    mask = attention_mask[0]  # prepare_mask_fn for the local-attention branch

    ref = danet_layer_local_reference(x, mask, wq, w1, w2, window_size=W)
    ref = jax.block_until_ready(ref)

    # f32 path (reference-accurate up to the approx-reciprocal MaxNorm).
    out = danet_layer_local(x, mask, wq, w1, w2, window_size=W)
    out = jax.block_until_ready(out)
    assert out.shape == (B, N, D)
    err = float(jnp.max(jnp.abs(out - ref)))
    # Slightly looser than exact-division tolerance: MaxNorm uses the EUP
    # approximate reciprocal.
    assert jnp.allclose(out, ref, rtol=2e-2, atol=2e-2), err

    # bf16-MXU operand path (q-projection / FFN matmuls only; window einsums
    # and all accumulation stay f32).
    out_bf16 = danet_layer_local(x, mask, wq, w1, w2, window_size=W,
                                 mxu_dtype=jnp.bfloat16)
    out_bf16 = jax.block_until_ready(out_bf16)
    err_bf16 = float(jnp.max(jnp.abs(out_bf16 - ref)))
    assert err_bf16 < 0.25, err_bf16

    # bf16 activations at the pallas_call boundary (halves activation DMA
    # bytes; f32 compute inside the kernel).
    out_act = danet_layer_local(x.astype(jnp.bfloat16), mask.astype(jnp.bfloat16),
                                wq, w1, w2, window_size=W,
                                mxu_dtype=jnp.bfloat16)
    out_act = jax.block_until_ready(out_act)
    assert out_act.shape == (B, N, D) and out_act.dtype == jnp.bfloat16
    err_act = float(jnp.max(jnp.abs(out_act.astype(jnp.float32) - ref)))
    assert err_act < 0.3, err_act

    print("KERNEL_OK")
</pallas_src>

<mosaic_0001>
module attributes {stable_mosaic.version = 11 : i64} {
  func.func @_danet_local_kernel(%arg0: i32, %arg1: memref<16x128xf32, #tpu.memory_space<vmem>>, %arg2: memref<64x1xf32, #tpu.memory_space<vmem>>, %arg3: memref<32x32xf32, #tpu.memory_space<vmem>>, %arg4: memref<32x64xf32, #tpu.memory_space<vmem>>, %arg5: memref<64x32xf32, #tpu.memory_space<vmem>>, %arg6: memref<16x128xf32, #tpu.memory_space<vmem>>) attributes {dimension_semantics = [#tpu.dimension_semantics<parallel>], iteration_bounds = array<i64: 1>, scalar_prefetch = 0 : i64, scratch_operands = 0 : i64, tpu.core_type = #tpu.core_type<tc>, window_params = [{transform_indices = @transform_0, window_bounds = array<i64: 16, 128>}, {transform_indices = @transform_1, window_bounds = array<i64: 64, 1>}, {pipeline_mode = #tpu.pipeline_mode<synchronous>, transform_indices = @transform_2, window_bounds = array<i64: 32, 32>}, {pipeline_mode = #tpu.pipeline_mode<synchronous>, transform_indices = @transform_3, window_bounds = array<i64: 32, 64>}, {pipeline_mode = #tpu.pipeline_mode<synchronous>, transform_indices = @transform_4, window_bounds = array<i64: 64, 32>}, {transform_indices = @transform_5, window_bounds = array<i64: 16, 128>}]} {
    %c0 = arith.constant 0 : index
    %c0_0 = arith.constant 0 : index
    %0 = vector.load %arg1[%c0, %c0_0] : memref<16x128xf32, #tpu.memory_space<vmem>>, vector<16x128xf32>
    %1 = vector.shape_cast %0 : vector<16x128xf32> to vector<64x32xf32>
    %2 = math.absf %1 : vector<64x32xf32>
    %cst = arith.constant dense<0xFF800000> : vector<64xf32>
    %3 = vector.multi_reduction <maximumf>, %2, %cst [1] : vector<64x32xf32> to vector<64xf32>
    %4 = vector.shape_cast %3 : vector<64xf32> to vector<64x1xf32>
    %cst_1 = arith.constant 9.99999974E-6 : f32
    %5 = vector.broadcast %cst_1 : f32 to vector<64x1xf32>
    %6 = arith.addf %4, %5 : vector<64x1xf32>
    %7 = tpu.reciprocal %6 {approx = true} : vector<64x1xf32> -> vector<64x1xf32>
    %c0_2 = arith.constant 0 : index
    %c0_3 = arith.constant 0 : index
    %8 = vector.load %arg2[%c0_2, %c0_3] : memref<64x1xf32, #tpu.memory_space<vmem>>, vector<64x1xf32>
    %9 = arith.mulf %7, %8 : vector<64x1xf32>
    %10 = vector.broadcast %9 : vector<64x1xf32> to vector<64x32xf32>
    %11 = arith.mulf %1, %10 : vector<64x32xf32>
    %c0_4 = arith.constant 0 : index
    %c0_5 = arith.constant 0 : index
    %12 = vector.load %arg3[%c0_4, %c0_5] : memref<32x32xf32, #tpu.memory_space<vmem>>, vector<32x32xf32>
    %cst_6 = arith.constant dense<0.000000e+00> : vector<64x32xf32>
    %13 = tpu.matmul %11, %12, %cst_6 {dimension_numbers = #tpu.dot_dimension_numbers<[1], [0], [0], [1], [0, 0, 1, 1], [], []>} : vector<64x32xf32>, vector<32x32xf32>, vector<64x32xf32> -> vector<64x32xf32>
    %14 = vector.shape_cast %11 : vector<64x32xf32> to vector<8x8x32xf32>
    %15 = vector.shape_cast %13 : vector<64x32xf32> to vector<8x8x32xf32>
    "tpu.trace_start"() <{level = 10 : i32, message = "nwd,nvd->nwv"}> : () -> ()
    %cst_7 = arith.constant dense<0.000000e+00> : vector<8x8x8xf32>
    %16 = tpu.matmul %15, %14, %cst_7 {dimension_numbers = #tpu.dot_dimension_numbers<[2], [2], [1], [1], [0, 0, 0, 1, 1, 1], [0], [0]>} : vector<8x8x32xf32>, vector<8x8x32xf32>, vector<8x8x8xf32> -> vector<8x8x8xf32>
    "tpu.trace_stop"() : () -> ()
    "tpu.trace_start"() <{level = 10 : i32, message = "nwv,nvd->nwd"}> : () -> ()
    %cst_8 = arith.constant dense<0.000000e+00> : vector<8x8x32xf32>
    %17 = tpu.matmul %16, %14, %cst_8 {dimension_numbers = #tpu.dot_dimension_numbers<[2], [1], [1], [2], [0, 0, 0, 1, 1, 2], [0], [0]>} : vector<8x8x8xf32>, vector<8x8x32xf32>, vector<8x8x32xf32> -> vector<8x8x32xf32>
    "tpu.trace_stop"() : () -> ()
    %18 = vector.shape_cast %17 : vector<8x8x32xf32> to vector<64x32xf32>
    %c0_9 = arith.constant 0 : index
    %c0_10 = arith.constant 0 : index
    %19 = vector.load %arg4[%c0_9, %c0_10] : memref<32x64xf32, #tpu.memory_space<vmem>>, vector<32x64xf32>
    %cst_11 = arith.constant dense<0.000000e+00> : vector<64x64xf32>
    %20 = tpu.matmul %18, %19, %cst_11 {dimension_numbers = #tpu.dot_dimension_numbers<[1], [0], [0], [1], [0, 0, 1, 1], [], []>} : vector<64x32xf32>, vector<32x64xf32>, vector<64x64xf32> -> vector<64x64xf32>
    %21 = arith.mulf %20, %20 : vector<64x64xf32>
    %22 = arith.mulf %20, %21 : vector<64x64xf32>
    %cst_12 = arith.constant 4.471500e-02 : f32
    %23 = vector.broadcast %cst_12 : f32 to vector<64x64xf32>
    %24 = arith.mulf %23, %22 : vector<64x64xf32>
    %25 = arith.addf %20, %24 : vector<64x64xf32>
    %cst_13 = arith.constant 0.797884583 : f32
    %26 = vector.broadcast %cst_13 : f32 to vector<64x64xf32>
    %27 = arith.mulf %26, %25 : vector<64x64xf32>
    %28 = math.tanh %27 : vector<64x64xf32>
    %cst_14 = arith.constant 1.000000e+00 : f32
    %29 = vector.broadcast %cst_14 : f32 to vector<64x64xf32>
    %30 = arith.addf %29, %28 : vector<64x64xf32>
    %cst_15 = arith.constant 5.000000e-01 : f32
    %31 = vector.broadcast %cst_15 : f32 to vector<64x64xf32>
    %32 = arith.mulf %31, %30 : vector<64x64xf32>
    %33 = arith.mulf %20, %32 : vector<64x64xf32>
    %c0_16 = arith.constant 0 : index
    %c0_17 = arith.constant 0 : index
    %34 = vector.load %arg5[%c0_16, %c0_17] : memref<64x32xf32, #tpu.memory_space<vmem>>, vector<64x32xf32>
    %cst_18 = arith.constant dense<0.000000e+00> : vector<64x32xf32>
    %35 = tpu.matmul %33, %34, %cst_18 {dimension_numbers = #tpu.dot_dimension_numbers<[1], [0], [0], [1], [0, 0, 1, 1], [], []>} : vector<64x64xf32>, vector<64x32xf32>, vector<64x32xf32> -> vector<64x32xf32>
    %36 = math.absf %35 : vector<64x32xf32>
    %cst_19 = arith.constant dense<0xFF800000> : vector<64xf32>
    %37 = vector.multi_reduction <maximumf>, %36, %cst_19 [1] : vector<64x32xf32> to vector<64xf32>
    %38 = vector.shape_cast %37 : vector<64xf32> to vector<64x1xf32>
    %cst_20 = arith.constant 9.99999974E-6 : f32
    %39 = vector.broadcast %cst_20 : f32 to vector<64x1xf32>
    %40 = arith.addf %38, %39 : vector<64x1xf32>
    %41 = tpu.reciprocal %40 {approx = true} : vector<64x1xf32> -> vector<64x1xf32>
    %42 = vector.broadcast %41 : vector<64x1xf32> to vector<64x32xf32>
    %43 = arith.mulf %35, %42 : vector<64x32xf32>
    %44 = arith.addf %43, %1 : vector<64x32xf32>
    %45 = vector.shape_cast %44 : vector<64x32xf32> to vector<16x128xf32>
    %c0_21 = arith.constant 0 : index
    %c0_22 = arith.constant 0 : index
    %46 = vector.load %arg6[%c0_21, %c0_22] : memref<16x128xf32, #tpu.memory_space<vmem>>, vector<16x128xf32>
    tpu.vector_store %arg6[%c0_21, %c0_22], %45 {strides = array<i32>} : memref<16x128xf32, #tpu.memory_space<vmem>>, vector<16x128xf32>,
    return
  }
  func.func @transform_0(%arg0: i32) -> (i32, i32) {
    %c0_i32 = arith.constant 0 : i32
    %c0_i32_0 = arith.constant 0 : i32
    return %arg0, %c0_i32 : i32, i32
  }
  func.func @transform_1(%arg0: i32) -> (i32, i32) {
    %c0_i32 = arith.constant 0 : i32
    %c0_i32_0 = arith.constant 0 : i32
    return %arg0, %c0_i32 : i32, i32
  }
  func.func @transform_2(%arg0: i32) -> (i32, i32) {
    %c0_i32 = arith.constant 0 : i32
    %c0_i32_0 = arith.constant 0 : i32
    %c0_i32_1 = arith.constant 0 : i32
    return %c0_i32, %c0_i32_0 : i32, i32
  }
  func.func @transform_3(%arg0: i32) -> (i32, i32) {
    %c0_i32 = arith.constant 0 : i32
    %c0_i32_0 = arith.constant 0 : i32
    %c0_i32_1 = arith.constant 0 : i32
    return %c0_i32, %c0_i32_0 : i32, i32
  }
  func.func @transform_4(%arg0: i32) -> (i32, i32) {
    %c0_i32 = arith.constant 0 : i32
    %c0_i32_0 = arith.constant 0 : i32
    %c0_i32_1 = arith.constant 0 : i32
    return %c0_i32, %c0_i32_0 : i32, i32
  }
  func.func @transform_5(%arg0: i32) -> (i32, i32) {
    %c0_i32 = arith.constant 0 : i32
    %c0_i32_0 = arith.constant 0 : i32
    return %arg0, %c0_i32 : i32, i32
  }
}

module attributes {stable_mosaic.version = 11 : i64} {
  func.func @_danet_local_kernel(%arg0: i32, %arg1: memref<64x32xf32, #tpu.memory_space<vmem>>, %arg2: memref<64x1xf32, #tpu.memory_space<vmem>>, %arg3: memref<32x32xf32, #tpu.memory_space<vmem>>, %arg4: memref<32x64xf32, #tpu.memory_space<vmem>>, %arg5: memref<64x32xf32, #tpu.memory_space<vmem>>, %arg6: memref<64x32xf32, #tpu.memory_space<vmem>>) attributes {dimension_semantics = [#tpu.dimension_semantics<parallel>], iteration_bounds = array<i64: 1>, scalar_prefetch = 0 : i64, scratch_operands = 0 : i64, tpu.core_type = #tpu.core_type<tc>, window_params = [{transform_indices = @transform_0, window_bounds = array<i64: 64, 32>}, {transform_indices = @transform_1, window_bounds = array<i64: 64, 1>}, {pipeline_mode = #tpu.pipeline_mode<synchronous>, transform_indices = @transform_2, window_bounds = array<i64: 32, 32>}, {pipeline_mode = #tpu.pipeline_mode<synchronous>, transform_indices = @transform_3, window_bounds = array<i64: 32, 64>}, {pipeline_mode = #tpu.pipeline_mode<synchronous>, transform_indices = @transform_4, window_bounds = array<i64: 64, 32>}, {transform_indices = @transform_5, window_bounds = array<i64: 64, 32>}]} {
    %c0 = arith.constant 0 : index
    %c0_0 = arith.constant 0 : index
    %0 = vector.load %arg1[%c0, %c0_0] : memref<64x32xf32, #tpu.memory_space<vmem>>, vector<64x32xf32>
    %1 = math.absf %0 : vector<64x32xf32>
    %cst = arith.constant dense<0xFF800000> : vector<64xf32>
    %2 = vector.multi_reduction <maximumf>, %1, %cst [1] : vector<64x32xf32> to vector<64xf32>
    %3 = vector.shape_cast %2 : vector<64xf32> to vector<64x1xf32>
    %cst_1 = arith.constant 9.99999974E-6 : f32
    %4 = vector.broadcast %cst_1 : f32 to vector<64x1xf32>
    %5 = arith.addf %3, %4 : vector<64x1xf32>
    %6 = tpu.reciprocal %5 {approx = true} : vector<64x1xf32> -> vector<64x1xf32>
    %c0_2 = arith.constant 0 : index
    %c0_3 = arith.constant 0 : index
    %7 = vector.load %arg2[%c0_2, %c0_3] : memref<64x1xf32, #tpu.memory_space<vmem>>, vector<64x1xf32>
    %8 = arith.mulf %6, %7 : vector<64x1xf32>
    %9 = vector.broadcast %8 : vector<64x1xf32> to vector<64x32xf32>
    %10 = arith.mulf %0, %9 : vector<64x32xf32>
    %c0_4 = arith.constant 0 : index
    %c0_5 = arith.constant 0 : index
    %11 = vector.load %arg3[%c0_4, %c0_5] : memref<32x32xf32, #tpu.memory_space<vmem>>, vector<32x32xf32>
    %cst_6 = arith.constant dense<0.000000e+00> : vector<64x32xf32>
    %12 = tpu.matmul %10, %11, %cst_6 {dimension_numbers = #tpu.dot_dimension_numbers<[1], [0], [0], [1], [0, 0, 1, 1], [], []>} : vector<64x32xf32>, vector<32x32xf32>, vector<64x32xf32> -> vector<64x32xf32>
    %13 = vector.shape_cast %10 : vector<64x32xf32> to vector<8x8x32xf32>
    %14 = vector.shape_cast %12 : vector<64x32xf32> to vector<8x8x32xf32>
    "tpu.trace_start"() <{level = 10 : i32, message = "nwd,nvd->nwv"}> : () -> ()
    %cst_7 = arith.constant dense<0.000000e+00> : vector<8x8x8xf32>
    %15 = tpu.matmul %14, %13, %cst_7 {dimension_numbers = #tpu.dot_dimension_numbers<[2], [2], [1], [1], [0, 0, 0, 1, 1, 1], [0], [0]>} : vector<8x8x32xf32>, vector<8x8x32xf32>, vector<8x8x8xf32> -> vector<8x8x8xf32>
    "tpu.trace_stop"() : () -> ()
    "tpu.trace_start"() <{level = 10 : i32, message = "nwv,nvd->nwd"}> : () -> ()
    %cst_8 = arith.constant dense<0.000000e+00> : vector<8x8x32xf32>
    %16 = tpu.matmul %15, %13, %cst_8 {dimension_numbers = #tpu.dot_dimension_numbers<[2], [1], [1], [2], [0, 0, 0, 1, 1, 2], [0], [0]>} : vector<8x8x8xf32>, vector<8x8x32xf32>, vector<8x8x32xf32> -> vector<8x8x32xf32>
    "tpu.trace_stop"() : () -> ()
    %17 = vector.shape_cast %16 : vector<8x8x32xf32> to vector<64x32xf32>
    %c0_9 = arith.constant 0 : index
    %c0_10 = arith.constant 0 : index
    %18 = vector.load %arg4[%c0_9, %c0_10] : memref<32x64xf32, #tpu.memory_space<vmem>>, vector<32x64xf32>
    %cst_11 = arith.constant dense<0.000000e+00> : vector<64x64xf32>
    %19 = tpu.matmul %17, %18, %cst_11 {dimension_numbers = #tpu.dot_dimension_numbers<[1], [0], [0], [1], [0, 0, 1, 1], [], []>} : vector<64x32xf32>, vector<32x64xf32>, vector<64x64xf32> -> vector<64x64xf32>
    %20 = arith.mulf %19, %19 : vector<64x64xf32>
    %21 = arith.mulf %19, %20 : vector<64x64xf32>
    %cst_12 = arith.constant 4.471500e-02 : f32
    %22 = vector.broadcast %cst_12 : f32 to vector<64x64xf32>
    %23 = arith.mulf %22, %21 : vector<64x64xf32>
    %24 = arith.addf %19, %23 : vector<64x64xf32>
    %cst_13 = arith.constant 0.797884583 : f32
    %25 = vector.broadcast %cst_13 : f32 to vector<64x64xf32>
    %26 = arith.mulf %25, %24 : vector<64x64xf32>
    %27 = math.tanh %26 : vector<64x64xf32>
    %cst_14 = arith.constant 1.000000e+00 : f32
    %28 = vector.broadcast %cst_14 : f32 to vector<64x64xf32>
    %29 = arith.addf %28, %27 : vector<64x64xf32>
    %cst_15 = arith.constant 5.000000e-01 : f32
    %30 = vector.broadcast %cst_15 : f32 to vector<64x64xf32>
    %31 = arith.mulf %30, %29 : vector<64x64xf32>
    %32 = arith.mulf %19, %31 : vector<64x64xf32>
    %c0_16 = arith.constant 0 : index
    %c0_17 = arith.constant 0 : index
    %33 = vector.load %arg5[%c0_16, %c0_17] : memref<64x32xf32, #tpu.memory_space<vmem>>, vector<64x32xf32>
    %cst_18 = arith.constant dense<0.000000e+00> : vector<64x32xf32>
    %34 = tpu.matmul %32, %33, %cst_18 {dimension_numbers = #tpu.dot_dimension_numbers<[1], [0], [0], [1], [0, 0, 1, 1], [], []>} : vector<64x64xf32>, vector<64x32xf32>, vector<64x32xf32> -> vector<64x32xf32>
    %35 = math.absf %34 : vector<64x32xf32>
    %cst_19 = arith.constant dense<0xFF800000> : vector<64xf32>
    %36 = vector.multi_reduction <maximumf>, %35, %cst_19 [1] : vector<64x32xf32> to vector<64xf32>
    %37 = vector.shape_cast %36 : vector<64xf32> to vector<64x1xf32>
    %cst_20 = arith.constant 9.99999974E-6 : f32
    %38 = vector.broadcast %cst_20 : f32 to vector<64x1xf32>
    %39 = arith.addf %37, %38 : vector<64x1xf32>
    %40 = tpu.reciprocal %39 {approx = true} : vector<64x1xf32> -> vector<64x1xf32>
    %41 = vector.broadcast %40 : vector<64x1xf32> to vector<64x32xf32>
    %42 = arith.mulf %34, %41 : vector<64x32xf32>
    %43 = arith.addf %42, %0 : vector<64x32xf32>
    %c0_21 = arith.constant 0 : index
    %c0_22 = arith.constant 0 : index
    %44 = vector.load %arg6[%c0_21, %c0_22] : memref<64x32xf32, #tpu.memory_space<vmem>>, vector<64x32xf32>
    tpu.vector_store %arg6[%c0_21, %c0_22], %43 {strides = array<i32>} : memref<64x32xf32, #tpu.memory_space<vmem>>, vector<64x32xf32>,
    return
  }
  func.func @transform_0(%arg0: i32) -> (i32, i32) {
    %c0_i32 = arith.constant 0 : i32
    %c0_i32_0 = arith.constant 0 : i32
    return %arg0, %c0_i32 : i32, i32
  }
  func.func @transform_1(%arg0: i32) -> (i32, i32) {
    %c0_i32 = arith.constant 0 : i32
    %c0_i32_0 = arith.constant 0 : i32
    return %arg0, %c0_i32 : i32, i32
  }
  func.func @transform_2(%arg0: i32) -> (i32, i32) {
    %c0_i32 = arith.constant 0 : i32
    %c0_i32_0 = arith.constant 0 : i32
    %c0_i32_1 = arith.constant 0 : i32
    return %c0_i32, %c0_i32_0 : i32, i32
  }
  func.func @transform_3(%arg0: i32) -> (i32, i32) {
    %c0_i32 = arith.constant 0 : i32
    %c0_i32_0 = arith.constant 0 : i32
    %c0_i32_1 = arith.constant 0 : i32
    return %c0_i32, %c0_i32_0 : i32, i32
  }
  func.func @transform_4(%arg0: i32) -> (i32, i32) {
    %c0_i32 = arith.constant 0 : i32
    %c0_i32_0 = arith.constant 0 : i32
    %c0_i32_1 = arith.constant 0 : i32
    return %c0_i32, %c0_i32_0 : i32, i32
  }
  func.func @transform_5(%arg0: i32) -> (i32, i32) {
    %c0_i32 = arith.constant 0 : i32
    %c0_i32_0 = arith.constant 0 : i32
    return %arg0, %c0_i32 : i32, i32
  }
}

</mosaic_0001>

<bundles_post_ra>
// kernel: tpu_custom_call.1
= control target key start
LH: loop header
LB: loop body
LE: loop exit
PB: predicated region body
PF: predicated region fallthrough
CT: control target
= control target key end

     0   :  { %vm36_vm0 = vcmask 261120   ;;  %v2219_v24 = vmov 0   ;;  %vm2221_vm1 = vmmov 0   ;;  %vm858_vm2 = vcmask 64512   ;;  %s2581_s0 = inlined_call_operand.vmem [shape: f32[64,32], index: 0, kind: input, shape index: {}]   ;;  %s2582_s2 = inlined_call_operand.vmem [shape: f32[32,32], index: 2, kind: input, shape index: {}]   ;;  %s2583_s1 = inlined_call_operand.vmem [shape: f32[64,1], index: 1, kind: input, shape index: {}]   ;;  %s2584_s3 = inlined_call_operand.vmem [shape: f32[32,64], index: 3, kind: input, shape index: {}]   ;;  %s2585_s4 = inlined_call_operand.vmem [shape: f32[64,32], index: 4, kind: input, shape index: {}]   ;;  %s2586_s5 = inlined_call_operand.vmem [shape: f32[64,32], index: 5, kind: output, shape index: {}]  }
   0x1   :  { %v2255_v0 = vld [vmem:[%s2581_s0] sm:$0xff]  ;;  %v2260_v1 = vld [vmem:[%s2581_s0 + $0x8] sm:$0xff]  ;;  %v2265_v2 = vld [vmem:[%s2581_s0 + $0x10] sm:$0xff]  ;;  %2169 = vset.pattern.permute.xlu0 %v2219_v24  ;;  %2170 = vset.pattern.permute.xlu1 %v2219_v24  ;;  %vm1656_vm3 = vcmask 523264  }
   0x2   :  { %v28_v3 = vand.u32 2147483647, %v2255_v0  ;;  %v29_v4 = vand.u32 2147483647, %v2260_v1  ;;  %v30_v5 = vand.u32 2147483647, %v2265_v2 }
   0x3   :  { %v2273_v6 = vld [vmem:[%s2581_s0 + $0x18] sm:$0xff]  ;;  %v2278_v7 = vld [vmem:[%s2581_s0 + $0x20] sm:$0xff]  ;;  %v2283_v8 = vld [vmem:[%s2581_s0 + $0x28] sm:$0xff] }
   0x4   :  { %v37_v9 = vsel %vm36_vm0, %v28_v3, -inf  ;;  %v43_v10 = vsel %vm36_vm0, %v30_v5, -inf  ;;  %v31_v11 = vand.u32 2147483647, %v2273_v6  ;;  %v40_v12 = vsel %vm36_vm0, %v29_v4, -inf  ;;  %v2295_v16 = vld [vmem:[%s2581_s0 + $0x30] sm:$0xff] }
   0x5   :  { %38 = vmax.xlane.f32.xlu0 %v37_v9  ;;  %44 = vmax.xlane.f32.xlu1 %v43_v10  ;;  %v32_v14 = vand.u32 2147483647, %v2278_v7  ;;  %v33_v15 = vand.u32 2147483647, %v2283_v8  ;;  %v2300_v17 = vld [vmem:[%s2581_s0 + $0x38] sm:$0xff]  ;;  %v141_v25 = vld [vmem:[%s2582_s2] sm:$0xff] }
   0x6   :  { %v46_v13 = vsel %vm36_vm0, %v31_v11, -inf  ;;  %v34_v20 = vand.u32 2147483647, %v2295_v16  ;;  %v35_v21 = vand.u32 2147483647, %v2300_v17  ;;  %v142_v26 = vld [vmem:[%s2582_s2 + $0x8] sm:$0xff] }
   0x7   :  { %v49_v18 = vsel %vm36_vm0, %v32_v14, -inf  ;;  %v52_v19 = vsel %vm36_vm0, %v33_v15, -inf  ;;  %v2130_v27 = vpack.c.bf16 %v142_v26, %v141_v25  ;;  %v77_v37 = vld [vmem:[%s2583_s1] sm:$0xff]  ;;  %v78_v43 = vld [vmem:[%s2583_s1 + $0x8] sm:$0xff]  ;;  %v143_v44 = vld [vmem:[%s2582_s2 + $0x10] sm:$0xff] }
   0x8   :  { %v55_v22 = vsel %vm36_vm0, %v34_v20, -inf  ;;  %v58_v23 = vsel %vm36_vm0, %v35_v21, -inf  ;;  %v144_v45 = vld [vmem:[%s2582_s2 + $0x18] sm:$0xff]  ;;  %v79_v50 = vld [vmem:[%s2583_s1 + $0x10] sm:$0xff]  ;;  %v81_v60 = vld [vmem:[%s2583_s1 + $0x20] sm:$0xff] }
   0x9   :  { %41 = vmax.xlane.f32.xlu0 %v40_v12  ;;  %47 = vmax.xlane.f32.xlu1 %v46_v13  ;;  %v2134_v48 = vpack.c.bf16 %v144_v45, %v143_v44  ;;  %v80_v56 = vld [vmem:[%s2583_s1 + $0x18] sm:$0xff]  ;;  %v82_v63 = vld [vmem:[%s2583_s1 + $0x28] sm:$0xff]  ;;  %v83_v5 = vld [vmem:[%s2583_s1 + $0x30] sm:$0xff]  ;;  %v2220_v12 = vmov 0.0  }
   0xa   :  { %2131 = vmatprep.subr.bf16.mxu0 %v2130_v27  ;;  %2162 = vmatprep.subr.bf16.mxu1 %v2130_v27  ;;  %v84_v11 = vld [vmem:[%s2583_s1 + $0x38] sm:$0xff] }
   0xb   :  { %2133 = vmatpush3.bf16.msra.mxu0 %v2130_v27  ;;  %2164 = vmatpush3.bf16.msra.mxu1 %v2130_v27 }
   0xc   :  { %2135 = vmatprep.subr.bf16.mxu0 %v2134_v48  ;;  %2163 = vmatprep.subr.bf16.mxu1 %v2134_v48 }
   0xd   :  { %50 = vmax.xlane.f32.xlu0 %v49_v18  ;;  %53 = vmax.xlane.f32.xlu1 %v52_v19 }
   0xf   :  { %2137 = vmatpush3.bf16.msra.mxu0 %v2134_v48  ;;  %2165 = vmatpush3.bf16.msra.mxu1 %v2134_v48  ;;  %v1443_v48 = vld [vmem:[%s2584_s3] sm:$0xff] }
  0x10   :  { %2027 = vmatprep.subr.mxu0 %v2220_v12  ;;  %2002 = vmatprep.subr.mxu1 %v2220_v12 }
  0x11   :  { %56 = vmax.xlane.f32.xlu0 %v55_v22  ;;  %59 = vmax.xlane.f32.xlu1 %v58_v23 }
  0x92   :  { %v39_v28 = vpop.xlane.xlu0 %38  ;;  %v45_v29 = vpop.xlane.xlu1 %44 }
  0x93   :  { %v61_v30 = vadd.f32 1e-05, %v39_v28  ;;  %v63_v31 = vadd.f32 1e-05, %v45_v29 }
  0x95   :  { %2171 = vrcp.f32 %v61_v30 }
  0x96   :  { %v42_v32 = vpop.xlane.xlu0 %41  ;;  %v48_v33 = vpop.xlane.xlu1 %47  ;;  %2173 = vrcp.f32 %v63_v31 }
  0x97   :  { %v62_v34 = vadd.f32 1e-05, %v42_v32  ;;  %v64_v35 = vadd.f32 1e-05, %v48_v33 }
  0x99   :  { %2175 = vrcp.f32 %v62_v34 }
  0x9a   :  { %v51_v36 = vpop.xlane.xlu0 %50  ;;  %2177 = vrcp.f32 %v64_v35  ;;  %v54_v39 = vpop.xlane.xlu1 %53 }
  0x9b   :  { %v65_v38 = vadd.f32 1e-05, %v51_v36  ;;  %v66_v42 = vadd.f32 1e-05, %v54_v39 }
  0x9d   :  { %2179 = vrcp.f32 %v65_v38 }
  0x9e   :  { %v57_v47 = vpop.xlane.xlu0 %56  ;;  %2181 = vrcp.f32 %v66_v42  ;;  %v60_v54 = vpop.xlane.xlu1 %59 }
  0x9f   :  { %v2172_v40 = vpop.eup %2171  ;;  %v67_v52 = vadd.f32 1e-05, %v57_v47  ;;  %v68_v57 = vadd.f32 1e-05, %v60_v54 }
  0xa0   :  { %v85_v41 = vmul.f32 %v2172_v40, %v77_v37  ;;  %v2174_v46 = vpop.eup %2173 }
  0xa1   :  { %v87_v53 = vmul.f32 %v2174_v46, %v79_v50  ;;  %2183 = vrcp.f32 %v67_v52 }
  0xa2   :  { %95 = vperm.xlu0 %2169, %v85_v41   ;;  %2185 = vrcp.f32 %v68_v57 }
  0xa3   :  { %v2176_v49 = vpop.eup %2175 }
  0xa4   :  { %v86_v51 = vmul.f32 %v2176_v49, %v78_v43  ;;  %v2178_v55 = vpop.eup %2177  ;;  %v1444_v49 = vld [vmem:[%s2584_s3 + $0x8] sm:$0xff] }
  0xa5   :  { %v88_v58 = vmul.f32 %v2178_v55, %v80_v56 }
  0xa6   :  { %100 = vperm.xlu1 %2170, %v86_v51  }
  0xa7   :  { %v2180_v59 = vpop.eup %2179 }
  0xa8   :  { %v89_v61 = vmul.f32 %v2180_v59, %v81_v60  ;;  %v2182_v62 = vpop.eup %2181  ;;  %v1445_v59 = vld [vmem:[%s2584_s3 + $0x10] sm:$0xff]  ;;  %v1446_v60 = vld [vmem:[%s2584_s3 + $0x18] sm:$0xff] }
  0xa9   :  { %v90_v3 = vmul.f32 %v2182_v62, %v82_v63 }
  0xaa   :  { %105 = vperm.xlu1 %2170, %v87_v53   ;;  %v2138_v53 = vpack.c.bf16 %v1444_v49, %v1443_v48 }
  0xab   :  { %v2184_v4 = vpop.eup %2183 }
  0xac   :  { %v91_v9 = vmul.f32 %v2184_v4, %v83_v5  ;;  %v2186_v10 = vpop.eup %2185 }
  0xad   :  { %v92_v13 = vmul.f32 %v2186_v10, %v84_v11 }
  0xae   :  { %110 = vperm.xlu1 %2170, %v88_v58  }
  0xb2   :  { %115 = vperm.xlu1 %2170, %v89_v61   ;;  %v2142_v61 = vpack.c.bf16 %v1446_v60, %v1445_v59 }
  0xb6   :  { %120 = vperm.xlu1 %2170, %v90_v3  }
  0xba   :  { %125 = vperm.xlu1 %2170, %v91_v9  }
  0xbe   :  { %130 = vperm.xlu1 %2170, %v92_v13  }
 0x121   :  { %v96_v14 = vpop.permute.xlu0 %95 }
 0x122   :  { %v2347_v15 = vmul.f32 %v96_v14, %v2255_v0 }
 0x124   :  { %1990 = vmatprep.mubr.msk.f32.mxu0 %vm36_vm0, %v2347_v15 }
 0x125   :  { %v101_v18 = vpop.permute.xlu1 %100 }
 0x126   :  { %v134_v19 = vmul.f32 %v101_v18, %v2260_v1 }
 0x128   :  { %1991 = vmatmul.mubr.msk.f32.vlgmr.msra.gmra.mrb[0].mxu0 %vm36_vm0, %v134_v19 }
 0x129   :  { %v106_v20 = vpop.permute.xlu1 %105 }
 0x12a   :  { %v2354_v21 = vmul.f32 %v106_v20, %v2265_v2 }
 0x12c   :  { %1993 = vmatprep.mubr.msk.f32.mxu0 %vm36_vm0, %v2354_v21 }
 0x12d   :  { %v111_v22 = vpop.permute.xlu1 %110 }
 0x12e   :  { %v2359_v23 = vmul.f32 %v111_v22, %v2273_v6  ;;  %v1648_v22 = vld [vmem:[%s2585_s4] sm:$0xff] }
 0x130   :  { %1994 = vmatmul.mubr.msk.f32.gmra.mrb[2].mxu0 %vm36_vm0, %v2359_v23 }
 0x131   :  { %v116_v24 = vpop.permute.xlu1 %115 }
 0x132   :  { %v2364_v25 = vmul.f32 %v116_v24, %v2278_v7 }
 0x134   :  { %1996 = vmatprep.mubr.msk.f32.mxu0 %vm36_vm0, %v2364_v25 }
 0x135   :  { %v121_v26 = vpop.permute.xlu1 %120 }
 0x136   :  { %v2369_v27 = vmul.f32 %v121_v26, %v2283_v8  ;;  %v1651_v26 = vld [vmem:[%s2585_s4 + $0x18] sm:$0xff] }
 0x138   :  { %1997 = vmatmul.mubr.msk.f32.gmra.mrb[4].mxu0 %vm36_vm0, %v2369_v27 }
 0x139   :  { %2028 = vmatpush3.xpose.msk.msra.mxu0 %vm36_vm0, %v2369_v27  ;;  %v126_v28 = vpop.permute.xlu1 %125  ;;  %2029 = vmatprep.mubr.msk.f32.mxu0 %vm2221_vm1, %v2220_v12 }
 0x13a   :  { %v2376_v29 = vmul.f32 %v126_v28, %v2295_v16  ;;  %2037 = vmatprep.subr.mxu0 %v2220_v12  ;;  %v1652_v28 = vld [vmem:[%s2585_s4 + $0x20] sm:$0xff] }
 0x13c   :  { %1999 = vmatprep.mubr.msk.f32.mxu1 %vm36_vm0, %v2376_v29 }
 0x13d   :  { %v131_v30 = vpop.permute.xlu1 %130 }
 0x13e   :  { %v2382_v31 = vmul.f32 %v131_v30, %v2300_v17 }
 0x140   :  { %2000 = vmatmul.mubr.msk.f32.vlgmr.msra.gmra.mrb[0].mxu1 %vm36_vm0, %v2382_v31 }
 0x141   :  { %2003 = vmatpush3.xpose.msk.msra.mxu1 %vm36_vm0, %v2347_v15  ;;  %2004 = vmatprep.mubr.msk.f32.mxu1 %vm2221_vm1, %v2220_v12 }
 0x142   :  { %2007 = vmatprep.subr.mxu1 %v2220_v12 }
 0x1fb   :  { %v1992_v32 = vpop.f32.mrb[0].mxu0 }
 0x1fc   :  { %v235_v33 = vpop.f32.mrb[1].mxu0 }
 0x1fd   :  { %2005 = vmatmul.mubr.msk.f32.vlgmr.msra.gmra.mrb[2].mxu1 %vm36_vm0, %v235_v33 }
 0x1fe   :  { %2008 = vmatpush3.xpose.msk.msra.mxu1 %vm36_vm0, %v134_v19  ;;  %2009 = vmatprep.mubr.msk.f32.mxu1 %vm2221_vm1, %v2220_v12 }
 0x1ff   :  { %2012 = vmatprep.subr.mxu1 %v2220_v12 }
 0x201   :  { %2010 = vmatmul.mubr.msk.f32.vlgmr.msra.gmra.mrb[4].mxu1 %vm36_vm0, %v1992_v32  ;;  %v1655_v32 = vld [vmem:[%s2585_s4 + $0x38] sm:$0xff] }
 0x202   :  { %2013 = vmatpush3.xpose.msk.msra.mxu1 %vm36_vm0, %v2354_v21  ;;  %2014 = vmatprep.mubr.msk.f32.mxu1 %vm2221_vm1, %v2220_v12 }
 0x203   :  { %v1995_v34 = vpop.f32.mrb[2].mxu0  ;;  %2017 = vmatprep.subr.mxu1 %v2220_v12 }
 0x204   :  { %v245_v35 = vpop.f32.mrb[3].mxu0 }
 0x205   :  { %2015 = vmatmul.mubr.msk.f32.vlgmr.msra.gmra.mrb[6].mxu1 %vm36_vm0, %v245_v35 }
 0x206   :  { %2018 = vmatpush3.xpose.msk.msra.mxu1 %vm36_vm0, %v2359_v23  ;;  %2019 = vmatprep.mubr.msk.f32.mxu1 %vm2221_vm1, %v2220_v12 }
 0x207   :  { %2022 = vmatprep.subr.mxu1 %v2220_v12 }
 0x209   :  { %2020 = vmatmul.mubr.msk.f32.vlgmr.msra.gmra.mrb[8].mxu1 %vm36_vm0, %v1995_v34 }
 0x20a   :  { %2023 = vmatpush3.xpose.msk.msra.mxu1 %vm36_vm0, %v2364_v25  ;;  %2024 = vmatprep.mubr.msk.f32.mxu1 %vm2221_vm1, %v2220_v12 }
 0x20b   :  { %v1998_v36 = vpop.f32.mrb[4].mxu0  ;;  %2032 = vmatprep.subr.mxu1 %v2220_v12 }
 0x20c   :  { %v255_v37 = vpop.f32.mrb[5].mxu0  ;;  %2030 = vmatmul.mubr.msk.f32.vlgmr.msra.gmra.mrb[6].mxu0 %vm36_vm0, %v1998_v36 }
 0x20d   :  { %2038 = vmatpush3.xpose.msk.msra.mxu0 %vm36_vm0, %v2382_v31  ;;  %2025 = vmatmul.mubr.msk.f32.vlgmr.msra.gmra.mrb[10].mxu1 %vm36_vm0, %v255_v37 }
 0x20e   :  { %2033 = vmatpush3.xpose.msk.msra.mxu1 %vm36_vm0, %v2376_v29  ;;  %2039 = vmatprep.mubr.msk.f32.mxu0 %vm2221_vm1, %v2220_v12 }
 0x20f   :  { %2047 = vmatprep.subr.mxu0 %v2220_v12  ;;  %2034 = vmatprep.mubr.msk.f32.mxu1 %vm2221_vm1, %v2220_v12 }
 0x210   :  { %2042 = vmatprep.subr.mxu1 %v2220_v12 }
 0x213   :  { %v2001_v38 = vpop.f32.mrb[0].mxu1 }
 0x214   :  { %v265_v39 = vpop.f32.mrb[1].mxu1  ;;  %2040 = vmatmul.mubr.msk.f32.vlgmr.msra.gmra.mrb[8].mxu0 %vm36_vm0, %v2001_v38 }
 0x215   :  { %2048 = vmatpush3.msra.mxu0 %v134_v19  ;;  %2035 = vmatmul.mubr.msk.f32.vlgmr.msra.gmra.mrb[12].mxu1 %vm36_vm0, %v265_v39 }
 0x216   :  { %2043 = vmatpush3.msra.mxu1 %v2347_v15  ;;  %2044 = vmatprep.mubr.msk.f32.mxu1 %vm2221_vm1, %v2220_v12 }
 0x217   :  { %2052 = vmatprep.subr.mxu1 %v2220_v12  ;;  %2049 = vmatprep.mubr.msk.f32.mxu0 %vm2221_vm1, %v2220_v12 }
 0x218   :  { %2057 = vmatprep.subr.mxu0 %v2220_v12 }
 0x2d0   :  { %v343_v40 = vpop.f32.mrb[2].mxu1 }
 0x2d1   :  { %v2006_v41 = vpop.f32.mrb[3].mxu1  ;;  %2045 = vmatmul.mubr.msk.f32.vlgmr.msra.gmra.mrb[14].mxu1 %vm858_vm2, %v343_v40 }
 0x2d2   :  { %2053 = vmatpush3.msra.mxu1 %v2354_v21  ;;  %2054 = vmatprep.mubr.msk.f32.mxu1 %vm2221_vm1, %v2220_v12 }
 0x2d3   :  { %2062 = vmatprep.subr.mxu1 %v2220_v12 }
 0x2d4   :  { %v416_v42 = vpop.f32.mrb[4].mxu1 }
 0x2d5   :  { %v2011_v43 = vpop.f32.mrb[5].mxu1  ;;  %2050 = vmatmul.mubr.msk.f32.vlgmr.msra.gmra.mrb[10].mxu0 %vm858_vm2, %v416_v42 }
 0x2d6   :  { %2058 = vmatpush3.msra.mxu0 %v2359_v23  ;;  %2059 = vmatprep.mubr.msk.f32.mxu0 %vm2221_vm1, %v2220_v12  ;;  %v1649_v23 = vld [vmem:[%s2585_s4 + $0x8] sm:$0xff] }
 0x2d7   :  { %2067 = vmatprep.subr.mxu0 %v2220_v12  ;;  %v2146_v24 = vpack.c.bf16 %v1649_v23, %v1648_v22 }
 0x2d8   :  { %v489_v44 = vpop.f32.mrb[6].mxu1 }
 0x2d9   :  { %v2016_v45 = vpop.f32.mrb[7].mxu1  ;;  %2055 = vmatmul.mubr.msk.f32.vlgmr.msra.gmra.mrb[16].mxu1 %vm858_vm2, %v489_v44 }
 0x2da   :  { %2063 = vmatpush3.msra.mxu1 %v2364_v25  ;;  %2064 = vmatprep.mubr.msk.f32.mxu1 %vm2221_vm1, %v2220_v12  ;;  %v1650_v25 = vld [vmem:[%s2585_s4 + $0x10] sm:$0xff] }
 0x2db   :  { %2072 = vmatprep.subr.mxu1 %v2220_v12 }
 0x2dc   :  { %v562_v46 = vpop.f32.mrb[8].mxu1 }
 0x2dd   :  { %v2021_v47 = vpop.f32.mrb[9].mxu1  ;;  %2060 = vmatmul.mubr.msk.f32.vlgmr.msra.gmra.mrb[12].mxu0 %vm858_vm2, %v562_v46 }
 0x2de   :  { %2068 = vmatpush3.msra.mxu0 %v2369_v27  ;;  %2069 = vmatprep.mubr.msk.f32.mxu0 %vm2221_vm1, %v2220_v12  ;;  %v2150_v27 = vpack.c.bf16 %v1651_v26, %v1650_v25 }
 0x2df   :  { %v708_v50 = vpop.f32.mrb[6].mxu0  ;;  %2077 = vmatprep.subr.mxu0 %v2220_v12 }
 0x2e0   :  { %v635_v51 = vpop.f32.mrb[10].mxu1  ;;  %v2031_v52 = vpop.f32.mrb[7].mxu0 }
 0x2e1   :  { %v2026_v54 = vpop.f32.mrb[11].mxu1  ;;  %2065 = vmatmul.mubr.msk.f32.vlgmr.msra.gmra.mrb[18].mxu1 %vm858_vm2, %v635_v51  ;;  %2070 = vmatmul.mubr.msk.f32.vlgmr.msra.gmra.mrb[14].mxu0 %vm858_vm2, %v708_v50 }
 0x2e2   :  { %2073 = vmatpush3.msra.mxu1 %v2376_v29  ;;  %2078 = vmatpush3.msra.mxu0 %v2382_v31  ;;  %v1653_v29 = vld [vmem:[%s2585_s4 + $0x28] sm:$0xff]  ;;  %v1654_v31 = vld [vmem:[%s2585_s4 + $0x30] sm:$0xff] }
 0x2e3   :  { %2079 = vmatprep.mubr.msk.f32.mxu0 %vm2221_vm1, %v2220_v12  ;;  %2074 = vmatprep.mubr.msk.f32.mxu1 %vm2221_vm1, %v2220_v12  ;;  %v2154_v30 = vpack.c.bf16 %v1653_v29, %v1652_v28  ;;  %v2158_v33 = vpack.c.bf16 %v1655_v32, %v1654_v31 }
 0x2e4   :  { %2139 = vmatprep.subr.bf16.mxu1 %v2138_v53  ;;  %2147 = vmatprep.subr.bf16.mxu0 %v2146_v24 }
 0x2e7   :  { %v854_v55 = vpop.f32.mrb[8].mxu0 }
 0x2e8   :  { %v781_v56 = vpop.f32.mrb[12].mxu1  ;;  %v2041_v57 = vpop.f32.mrb[9].mxu0  ;;  %2080 = vmatmul.mubr.msk.f32.vlgmr.msra.gmra.mrb[16].mxu0 %vm858_vm2, %v854_v55 }
 0x2e9   :  { %v2036_v58 = vpop.f32.mrb[13].mxu1  ;;  %2075 = vmatmul.mubr.msk.f32.vlgmr.msra.gmra.mrb[20].mxu1 %vm858_vm2, %v781_v56  ;;  %2149 = vmatpush3.bf16.msra.mxu0 %v2146_v24 }
 0x2ea   :  { %2141 = vmatpush3.bf16.msra.mxu1 %v2138_v53  ;;  %2151 = vmatprep.subr.bf16.mxu0 %v2150_v27 }
 0x2eb   :  { %2143 = vmatprep.subr.bf16.mxu1 %v2142_v61 }
 0x2ed   :  { %2153 = vmatpush3.bf16.msra.mxu0 %v2150_v27 }
 0x2ee   :  { %2145 = vmatpush3.bf16.msra.mxu1 %v2142_v61  ;;  %2155 = vmatprep.subr.bf16.mxu0 %v2154_v30 }
 0x2f1   :  { %2157 = vmatpush3.bf16.msra.mxu0 %v2154_v30 }
 0x2f2   :  { %2159 = vmatprep.subr.bf16.mxu0 %v2158_v33 }
 0x2f5   :  { %2161 = vmatpush3.bf16.msra.mxu0 %v2158_v33 }
 0x3a4   :  { %v928_v62 = vpop.f32.mrb[14].mxu1 }
 0x3a5   :  { %v2046_v63 = vpop.f32.mrb[15].mxu1  ;;  %2090 = vmatprep.mubr.msk.f32.mxu1 %vm36_vm0, %v928_v62 }
 0x3a8   :  { %v1001_v3 = vpop.f32.mrb[10].mxu0 }
 0x3a9   :  { %v2051_v4 = vpop.f32.mrb[11].mxu0  ;;  %2091 = vmatmul.mubr.msk.f32.vlgmr.msra.gmra.mrb[22].mxu1 %vm36_vm0, %v1001_v3 }
 0x3ac   :  { %v1074_v5 = vpop.f32.mrb[16].mxu1 }
 0x3ad   :  { %v2056_v9 = vpop.f32.mrb[17].mxu1  ;;  %2093 = vmatprep.mubr.msk.f32.mxu1 %vm36_vm0, %v1074_v5 }
 0x3b0   :  { %v1147_v10 = vpop.f32.mrb[12].mxu0 }
 0x3b1   :  { %v2061_v11 = vpop.f32.mrb[13].mxu0  ;;  %2094 = vmatmul.mubr.msk.f32.gmra.mrb[24].mxu1 %vm36_vm0, %v1147_v10 }
 0x3b4   :  { %v1220_v12 = vpop.f32.mrb[18].mxu1  ;;  %v1293_v13 = vpop.f32.mrb[14].mxu0 }
 0x3b5   :  { %v2066_v14 = vpop.f32.mrb[19].mxu1  ;;  %v2071_v15 = vpop.f32.mrb[15].mxu0  ;;  %2096 = vmatprep.mubr.msk.f32.mxu1 %vm36_vm0, %v1220_v12 }
 0x3b6   :  { %2097 = vmatmul.mubr.msk.f32.gmra.mrb[26].mxu1 %vm36_vm0, %v1293_v13 }
 0x3bb   :  { %v1439_v18 = vpop.f32.mrb[16].mxu0 }
 0x3bc   :  { %v1366_v19 = vpop.f32.mrb[20].mxu1  ;;  %v2081_v20 = vpop.f32.mrb[17].mxu0 }
 0x3bd   :  { %v2076_v21 = vpop.f32.mrb[21].mxu1  ;;  %2099 = vmatprep.mubr.msk.f32.mxu1 %vm36_vm0, %v1366_v19 }
 0x3be   :  { %2100 = vmatmul.mubr.msk.f32.gmra.mrb[28].mxu1 %vm36_vm0, %v1439_v18 }
 0x47c   :  { %v2092_v34 = vpop.f32.mrb[22].mxu1 }
 0x47d   :  { %v1577_v35 = vmul.f32 %v2092_v34, %v2092_v34  ;;  %v1537_v36 = vpop.f32.mrb[23].mxu1 }
 0x47e   :  { %v1576_v37 = vmul.f32 %v1537_v36, %v1537_v36 }
 0x47f   :  { %v1585_v38 = vmul.f32 %v2092_v34, %v1577_v35 }
 0x480   :  { %v1584_v39 = vmul.f32 %v1576_v37, %v1537_v36 }
 0x481   :  { %v1593_v40 = vmul.f32 0.044715, %v1585_v38 }
 0x482   :  { %v1592_v41 = vmul.f32 0.044715, %v1584_v39 }
 0x483   :  { %v1601_v42 = vadd.f32 %v2092_v34, %v1593_v40 }
 0x484   :  { %v1600_v43 = vadd.f32 %v1592_v41, %v1537_v36  ;;  %v2511_v44 = vpop.f32.mrb[24].mxu1 }
 0x485   :  { %v1609_v45 = vmul.f32 0.7978846, %v1601_v42  ;;  %v1579_v46 = vmul.f32 %v2511_v44, %v2511_v44  ;;  %v1547_v47 = vpop.f32.mrb[25].mxu1 }
 0x486   :  { %v1608_v48 = vmul.f32 0.7978846, %v1600_v43  ;;  %v1578_v49 = vmul.f32 %v1547_v47, %v1547_v47 }
 0x487   :  { %2187 = vtanh.f32 %v1609_v45  ;;  %v1587_v50 = vmul.f32 %v2511_v44, %v1579_v46 }
 0x488   :  { %2189 = vtanh.f32 %v1608_v48  ;;  %v1586_v51 = vmul.f32 %v1578_v49, %v1547_v47 }
 0x489   :  { %v1595_v52 = vmul.f32 0.044715, %v1587_v50  ;;  %v2516_v53 = vpop.f32.mrb[26].mxu1 }
 0x48a   :  { %v1594_v54 = vmul.f32 0.044715, %v1586_v51  ;;  %v1581_v55 = vmul.f32 %v2516_v53, %v2516_v53  ;;  %v1557_v56 = vpop.f32.mrb[27].mxu1 }
 0x48b   :  { %v1603_v57 = vadd.f32 %v2511_v44, %v1595_v52  ;;  %v1580_v58 = vmul.f32 %v1557_v56, %v1557_v56 }
 0x48c   :  { %v1602_v59 = vadd.f32 %v1594_v54, %v1547_v47  ;;  %v1589_v60 = vmul.f32 %v2516_v53, %v1581_v55 }
 0x48d   :  { %v1611_v61 = vmul.f32 0.7978846, %v1603_v57  ;;  %v1588_v62 = vmul.f32 %v1580_v58, %v1557_v56 }
 0x48e   :  { %v1610_v63 = vmul.f32 0.7978846, %v1602_v59  ;;  %v1597_v3 = vmul.f32 0.044715, %v1589_v60 }
 0x48f   :  { %2191 = vtanh.f32 %v1611_v61  ;;  %v1596_v4 = vmul.f32 0.044715, %v1588_v62 }
 0x490   :  { %2193 = vtanh.f32 %v1610_v63  ;;  %v1605_v5 = vadd.f32 %v2516_v53, %v1597_v3 }
 0x491   :  { %v2188_v9 = vpop.eup %2187  ;;  %v1604_v10 = vadd.f32 %v1596_v4, %v1557_v56  ;;  %v2101_v11 = vpop.f32.mrb[28].mxu1 }
 0x492   :  { %v2190_v12 = vpop.eup %2189  ;;  %v1625_v13 = vadd.f32 1.0, %v2188_v9  ;;  %v1613_v14 = vmul.f32 0.7978846, %v1605_v5  ;;  %v1583_v15 = vmul.f32 %v2101_v11, %v2101_v11  ;;  %v1567_v18 = vpop.f32.mrb[29].mxu1 }
 0x493   :  { %v1624_v19 = vadd.f32 1.0, %v2190_v12  ;;  %v1612_v20 = vmul.f32 0.7978846, %v1604_v10  ;;  %v1582_v21 = vmul.f32 %v1567_v18, %v1567_v18 }
 0x494   :  { %v1633_v22 = vmul.f32 0.5, %v1625_v13  ;;  %2195 = vtanh.f32 %v1613_v14  ;;  %v1591_v23 = vmul.f32 %v2101_v11, %v1583_v15 }
 0x495   :  { %v1632_v24 = vmul.f32 0.5, %v1624_v19  ;;  %2197 = vtanh.f32 %v1612_v20  ;;  %v1590_v25 = vmul.f32 %v1582_v21, %v1567_v18 }
 0x496   :  { %v1599_v26 = vmul.f32 0.044715, %v1591_v23  ;;  %v1641_v29 = vmul.f32 %v2092_v34, %v1633_v22 }
 0x497   :  { %v1640_v27 = vmul.f32 %v1632_v24, %v1537_v36  ;;  %v1598_v28 = vmul.f32 0.044715, %v1590_v25 }
 0x498   :  { %v1607_v30 = vadd.f32 %v2101_v11, %v1599_v26 }
 0x499   :  { %v2192_v31 = vpop.eup %2191  ;;  %v1606_v32 = vadd.f32 %v1598_v28, %v1567_v18  ;;  %2118 = vmatprep.mubr.msk.f32.mxu0 %vm1656_vm3, %v1640_v27 }
 0x49a   :  { %v2194_v33 = vpop.eup %2193  ;;  %v1627_v35 = vadd.f32 1.0, %v2192_v31  ;;  %v1615_v37 = vmul.f32 0.7978846, %v1607_v30  ;;  %2119 = vmatmul.mubr.msk.f32.vlgmr.msra.gmra.mrb[18].mxu0 %vm1656_vm3, %v1641_v29 }
 0x49b   :  { %v1626_v38 = vadd.f32 1.0, %v2194_v33  ;;  %v1614_v39 = vmul.f32 0.7978846, %v1606_v32 }
 0x49c   :  { %v1635_v40 = vmul.f32 0.5, %v1627_v35  ;;  %2199 = vtanh.f32 %v1615_v37 }
 0x49d   :  { %v1634_v41 = vmul.f32 0.5, %v1626_v38  ;;  %2201 = vtanh.f32 %v1614_v39 }
 0x49e   :  { %v2196_v42 = vpop.eup %2195  ;;  %v1643_v45 = vmul.f32 %v2511_v44, %v1635_v40 }
 0x49f   :  { %v2198_v36 = vpop.eup %2197  ;;  %v1642_v43 = vmul.f32 %v1634_v41, %v1547_v47  ;;  %v1629_v34 = vadd.f32 1.0, %v2196_v42 }
 0x4a0   :  { %v1628_v46 = vadd.f32 1.0, %v2198_v36 }
 0x4a1   :  { %v1637_v48 = vmul.f32 0.5, %v1629_v34  ;;  %2121 = vmatprep.mubr.msk.f32.mxu0 %vm1656_vm3, %v1642_v43 }
 0x4a2   :  { %v1636_v49 = vmul.f32 0.5, %v1628_v46  ;;  %2122 = vmatmul.mubr.msk.f32.gmra.mrb[20].mxu0 %vm1656_vm3, %v1643_v45 }
 0x4a3   :  { %v1645_v51 = vmul.f32 %v2516_v53, %v1637_v48 }
 0x4a4   :  { %v1644_v50 = vmul.f32 %v1636_v49, %v1557_v56 }
 0x4a6   :  { %v2200_v52 = vpop.eup %2199  ;;  %2124 = vmatprep.mubr.msk.f32.mxu0 %vm1656_vm3, %v1644_v50 }
 0x4a7   :  { %v2202_v54 = vpop.eup %2201  ;;  %v1631_v55 = vadd.f32 1.0, %v2200_v52  ;;  %2125 = vmatmul.mubr.msk.f32.gmra.mrb[22].mxu0 %vm1656_vm3, %v1645_v51 }
 0x4a8   :  { %v1630_v47 = vadd.f32 1.0, %v2202_v54 }
 0x4a9   :  { %v1639_v57 = vmul.f32 0.5, %v1631_v55 }
 0x4aa   :  { %v1638_v44 = vmul.f32 0.5, %v1630_v47 }
 0x4ab   :  { %v1647_v59 = vmul.f32 %v2101_v11, %v1639_v57 }
 0x4ac   :  { %v1646_v58 = vmul.f32 %v1638_v44, %v1567_v18 }
 0x4ae   :  { %2127 = vmatprep.mubr.msk.f32.mxu0 %vm1656_vm3, %v1646_v58 }
 0x4af   :  { %2128 = vmatmul.mubr.msk.f32.gmra.mrb[24].mxu0 %vm1656_vm3, %v1647_v59 }
 0x56d   :  { %v2120_v60 = vpop.f32.mrb[18].mxu0 }
 0x56e   :  { %v1787_v56 = vand.u32 2147483647, %v2120_v60  ;;  %v1747_v61 = vpop.f32.mrb[19].mxu0 }
 0x56f   :  { %v1786_v53 = vand.u32 2147483647, %v1747_v61 }
 0x570   :  { %v1797_v62 = vsel %vm36_vm0, %v1787_v56, -inf }
 0x571   :  { %1798 = vmax.xlane.f32.xlu0 %v1797_v62  ;;  %v1794_v63 = vsel %vm36_vm0, %v1786_v53, -inf }
 0x572   :  { %1795 = vmax.xlane.f32.xlu1 %v1794_v63 }
 0x575   :  { %v2123_v3 = vpop.f32.mrb[20].mxu0 }
 0x576   :  { %v1789_v4 = vand.u32 2147483647, %v2123_v3  ;;  %v1757_v5 = vpop.f32.mrb[21].mxu0 }
 0x577   :  { %v1788_v9 = vand.u32 2147483647, %v1757_v5 }
 0x578   :  { %v1803_v10 = vsel %vm36_vm0, %v1789_v4, -inf }
 0x579   :  { %1804 = vmax.xlane.f32.xlu1 %v1803_v10  ;;  %v1800_v11 = vsel %vm36_vm0, %v1788_v9, -inf }
 0x57a   :  { %1801 = vmax.xlane.f32.xlu0 %v1800_v11  ;;  %v2126_v12 = vpop.f32.mrb[22].mxu0 }
 0x57b   :  { %v1791_v13 = vand.u32 2147483647, %v2126_v12  ;;  %v1767_v14 = vpop.f32.mrb[23].mxu0 }
 0x57c   :  { %v1790_v15 = vand.u32 2147483647, %v1767_v14 }
 0x57d   :  { %v1809_v18 = vsel %vm36_vm0, %v1791_v13, -inf }
 0x57e   :  { %1810 = vmax.xlane.f32.xlu1 %v1809_v18  ;;  %v1806_v19 = vsel %vm36_vm0, %v1790_v15, -inf }
 0x57f   :  { %1807 = vmax.xlane.f32.xlu0 %v1806_v19 }
 0x582   :  { %v2129_v20 = vpop.f32.mrb[24].mxu0 }
 0x583   :  { %v1793_v21 = vand.u32 2147483647, %v2129_v20  ;;  %v1777_v22 = vpop.f32.mrb[25].mxu0 }
 0x584   :  { %v1792_v23 = vand.u32 2147483647, %v1777_v22 }
 0x585   :  { %v1815_v24 = vsel %vm36_vm0, %v1793_v21, -inf }
 0x586   :  { %1816 = vmax.xlane.f32.xlu1 %v1815_v24  ;;  %v1812_v25 = vsel %vm36_vm0, %v1792_v23, -inf }
 0x587   :  { %1813 = vmax.xlane.f32.xlu0 %v1812_v25 }
 0x5fe   :  { %v1799_v26 = vpop.xlane.xlu0 %1798 }
 0x5ff   :  { %v1819_v27 = vadd.f32 1e-05, %v1799_v26  ;;  %v1796_v28 = vpop.xlane.xlu1 %1795 }
 0x600   :  { %v1818_v29 = vadd.f32 1e-05, %v1796_v28 }
 0x601   :  { %2203 = vrcp.f32 %v1819_v27 }
 0x602   :  { %2205 = vrcp.f32 %v1818_v29 }
 0x606   :  { %v1805_v30 = vpop.xlane.xlu1 %1804 }
 0x607   :  { %v1821_v31 = vadd.f32 1e-05, %v1805_v30  ;;  %v1802_v32 = vpop.xlane.xlu0 %1801 }
 0x608   :  { %v1820_v33 = vadd.f32 1e-05, %v1802_v32 }
 0x609   :  { %2207 = vrcp.f32 %v1821_v31 }
 0x60a   :  { %2209 = vrcp.f32 %v1820_v33 }
 0x60b   :  { %v2204_v35 = vpop.eup %2203  ;;  %v1811_v37 = vpop.xlane.xlu1 %1810 }
 0x60c   :  { %v2206_v38 = vpop.eup %2205  ;;  %v1835_v39 = vmul.f32 %v2204_v35, %v2120_v60  ;;  %v1823_v40 = vadd.f32 1e-05, %v1811_v37  ;;  %v1808_v41 = vpop.xlane.xlu0 %1807 }
 0x60d   :  { %v1834_v42 = vmul.f32 %v2206_v38, %v1747_v61  ;;  %v1822_v36 = vadd.f32 1e-05, %v1808_v41 }
 0x60e   :  { %v1843_v43 = vadd.f32 %v1835_v39, %v2260_v1  ;;  %2211 = vrcp.f32 %v1823_v40 }
 0x60f   :  { %v1842_v34 = vadd.f32 %v1834_v42, %v2255_v0  ;;  %2213 = vrcp.f32 %v1822_v36 }
 0x610   :  { %1851 = vst.msk [vmem:[%s2586_s5 + $0x8] sm:$0xff] %vm36_vm0, %v1843_v43 }
 0x611   :  { %1850 = vst.msk [vmem:[%s2586_s5] sm:$0xff] %vm36_vm0, %v1842_v34 }
 0x613   :  { %v2208_v45 = vpop.eup %2207  ;;  %v1817_v46 = vpop.xlane.xlu1 %1816 }
 0x614   :  { %v2210_v48 = vpop.eup %2209  ;;  %v1837_v49 = vmul.f32 %v2208_v45, %v2123_v3  ;;  %v1825_v50 = vadd.f32 1e-05, %v1817_v46  ;;  %v1814_v1 = vpop.xlane.xlu0 %1813 }
 0x615   :  { %v1836_v51 = vmul.f32 %v2210_v48, %v1757_v5  ;;  %v1824_v52 = vadd.f32 1e-05, %v1814_v1 }
 0x616   :  { %v1845_v0 = vadd.f32 %v1837_v49, %v2273_v6  ;;  %2215 = vrcp.f32 %v1825_v50 }
 0x617   :  { %v1844_v54 = vadd.f32 %v1836_v51, %v2265_v2  ;;  %2217 = vrcp.f32 %v1824_v52 }
 0x618   :  { %v2212_v55 = vpop.eup %2211  ;;  %1853 = vst.msk [vmem:[%s2586_s5 + $0x18] sm:$0xff] %vm36_vm0, %v1845_v0 }
 0x619   :  { %v2214_v47 = vpop.eup %2213  ;;  %1852 = vst.msk [vmem:[%s2586_s5 + $0x10] sm:$0xff] %vm36_vm0, %v1844_v54  ;;  %v1839_v57 = vmul.f32 %v2212_v55, %v2126_v12 }
 0x61a   :  { %v1838_v44 = vmul.f32 %v2214_v47, %v1767_v14 }
 0x61b   :  { %v1847_v6 = vadd.f32 %v1839_v57, %v2283_v8 }
 0x61c   :  { %v1846_v58 = vadd.f32 %v1838_v44, %v2278_v7 }
 0x61d   :  { %1855 = vst.msk [vmem:[%s2586_s5 + $0x28] sm:$0xff] %vm36_vm0, %v1847_v6 }
 0x61e   :  { %1854 = vst.msk [vmem:[%s2586_s5 + $0x20] sm:$0xff] %vm36_vm0, %v1846_v58 }
 0x620   :  { %v2216_v2 = vpop.eup %2215 }
 0x621   :  { %v2218_v59 = vpop.eup %2217  ;;  %v1841_v60 = vmul.f32 %v2216_v2, %v2129_v20 }
 0x622   :  { %v1840_v56 = vmul.f32 %v2218_v59, %v1777_v22 }
 0x623   :  { %v1849_v61 = vadd.f32 %v1841_v60, %v2300_v17 }
 0x624   :  { %v1848_v8 = vadd.f32 %v1840_v56, %v2295_v16 }
 0x625   :  { %1857 = vst.msk [vmem:[%s2586_s5 + $0x38] sm:$0xff] %vm36_vm0, %v1849_v61 }
 0x626   :  { %1856 = vst.msk [vmem:[%s2586_s5 + $0x30] sm:$0xff] %vm36_vm0, %v1848_v8 }

</bundles_post_ra>
